<compile_context>
chip_gen: v7x
topology: tpu7x:2x2x1
jax: 0.10.0
libtpu: 0.0.40
codegen_flags: <defaults>
</compile_context>

<pallas_src>
import functools

import jax
import jax.numpy as jnp
from jax.experimental import pallas as pl
from jax.experimental.pallas import tpu as pltpu


# ----------------------------- helpers ---------------------------------------


def _round_up(x, m):
    return ((x + m - 1) // m) * m


def _next_pow2(x):
    return 1 << (x - 1).bit_length()


def _pad_to(a, shape):
    pads = [(0, t - s) for s, t in zip(a.shape, shape)]
    if any(p for _, p in pads):
        return jnp.pad(a, pads)
    return a


def _softplus(t):
    # Numerically stable softplus: log(1 + exp(t)) overflows for large t.
    return jnp.maximum(t, 0.0) + jnp.log(1.0 + jnp.exp(-jnp.abs(t)))


# ----------------------------- kernels ---------------------------------------


def _encoder_kernel(latent, x_ref, w1_ref, b1_ref, wh_ref, bh_ref, eps_ref,
                    out_ref, acc_ref):
    """Fused encoder MLP + reparameterize + per-row KL summand.

    grid = (batch tiles, K tiles); K (= seq_len * padded_alphabet) is the
    innermost "arbitrary" reduction axis; the hidden pre-activation is
    accumulated in an f32 VMEM scratch.  The finalize step writes a single
    lane-dense packed slab [mu | var | z | kl(broadcast)] of width 4*L_pad.
    """
    k = pl.program_id(1)

    @pl.when(k == 0)
    def _():
        acc_ref[...] = jnp.zeros_like(acc_ref)

    # bf16 x bf16 -> f32 accumulation of the hidden pre-activation.
    acc_ref[...] += jnp.dot(x_ref[...], w1_ref[...],
                            preferred_element_type=jnp.float32)

    @pl.when(k == pl.num_programs(1) - 1)
    def _():
        lp = eps_ref.shape[-1]                       # padded latent width
        h = jnp.maximum(acc_ref[...] + b1_ref[...], 0.0)
        # Single wide head matmul: [W_mu | W_var] concatenated to (H, 2*L_pad).
        head = jnp.dot(h.astype(wh_ref.dtype), wh_ref[...],
                       preferred_element_type=jnp.float32) + bh_ref[...]
        mu = head[:, :lp]                            # 128-lane-aligned split
        var = _softplus(head[:, lp:])                # positive variance
        z = mu + jnp.sqrt(var) * eps_ref[...]

        # KL summand per row: log N(z;0,I) - log_normal_diag(z, mu, var).
        # The -0.5*D*log(2*pi) constants cancel exactly; the reference quirk
        # of passing `var` where a log-variance is expected is preserved.
        lane = jax.lax.broadcasted_iota(jnp.int32, mu.shape, 1)
        mask = (lane < latent).astype(jnp.float32)   # drop padded latent dims
        diff = (-0.5 * z * z + 0.5 * var
                + 0.5 * jnp.exp(-var) * (z - mu) ** 2) * mask
        kl = jnp.sum(diff, axis=-1, keepdims=True)

        # Lane-dense packed slab (each section 128-lane aligned, wide stores).
        out_ref[:, 0 * lp:1 * lp] = mu
        out_ref[:, 1 * lp:2 * lp] = var
        out_ref[:, 2 * lp:3 * lp] = z
        out_ref[:, 3 * lp:4 * lp] = jnp.broadcast_to(kl, mu.shape)


def _decoder_kernel(switch_ref, z_ref, w1_ref, b1_ref, wh_ref, bh_ref,
                    gsum_ref, bcast_ref, xmean_ref, xvar_ref, h_ref):
    """Fused decoder MLP + per-position alphabet softmax + variance switch.

    grid = (batch tiles, output-column tiles).  The hidden activation h only
    depends on the batch tile, so it is computed once per batch tile under
    @pl.when(n == 0) into a bf16 VMEM scratch (column axis is "arbitrary").
    """
    n = pl.program_id(1)

    @pl.when(n == 0)
    def _():
        h = jnp.dot(z_ref[...].astype(w1_ref.dtype), w1_ref[...],
                    preferred_element_type=jnp.float32) + b1_ref[...]
        h_ref[...] = jnp.maximum(h, 0.0).astype(h_ref.dtype)

    # Single wide head matmul per tile: [W_mean_tile | W_var_tile].
    head = jnp.dot(h_ref[...], wh_ref[...],
                   preferred_element_type=jnp.float32) + bh_ref[...]
    tn = xmean_ref.shape[-1]
    logits = head[:, :tn]
    t = head[:, tn:]

    # Softmax over each group of A_pad consecutive columns (one sequence
    # position), computed lane-dense:
    #   * stabilize with the row max (same constant per row -> softmax invariant)
    #   * exponentiate, round once to bf16 and use the SAME values as numerator
    #     and as input to the (tn, P) 0/1 group-sum matmul -> the f32-accumulated
    #     per-position sums are exact for those values
    #   * exact f32 reciprocal, broadcast back to all columns with a (P, tn)
    #     0/1 bf16 matmul (rectangular: >= A/2 less MXU work than a square one).
    # Row sums are 1 up to one bf16 rounding of the reciprocal (~2^-8 worst case).
    row_max = jnp.max(logits, axis=-1, keepdims=True)
    e = jnp.exp(logits - row_max).astype(jnp.bfloat16)
    denom = jnp.dot(e, gsum_ref[...], preferred_element_type=jnp.float32)
    denom = jnp.maximum(denom, 1e-30)            # guard all-underflow groups
    inv = (1.0 / denom).astype(jnp.bfloat16)
    inv_full = jnp.dot(inv, bcast_ref[...], preferred_element_type=jnp.float32)
    xmean_ref[...] = e.astype(jnp.float32) * inv_full

    s = switch_ref[0, 0]
    xvar_ref[...] = s * _softplus(t) + (1.0 - s) * (0.02 * 0.02)


# ----------------------------- wrappers ---------------------------------------


def init_params(key, seq_len, alphabet, hidden, latent):
    d_in = seq_len * alphabet
    ks = jax.random.split(key, 6)

    def lin(k, fan_in, fan_out):
        return (jax.random.normal(k, (fan_in, fan_out), jnp.float32)
                * (1.0 / jnp.sqrt(jnp.float32(fan_in))))

    return dict(
        enc_w1=lin(ks[0], d_in, hidden),
        enc_b1=jnp.zeros((1, hidden), jnp.float32),
        enc_wmu=lin(ks[1], hidden, latent),
        enc_bmu=jnp.zeros((1, latent), jnp.float32),
        enc_wlv=lin(ks[2], hidden, latent),
        enc_blv=jnp.zeros((1, latent), jnp.float32),
        dec_w1=lin(ks[3], latent, hidden),
        dec_b1=jnp.zeros((1, hidden), jnp.float32),
        dec_wm=lin(ks[4], hidden, d_in),
        dec_bm=jnp.zeros((1, d_in), jnp.float32),
        dec_wv=lin(ks[5], hidden, d_in),
        dec_bv=jnp.zeros((1, d_in), jnp.float32),
    )


def deepsequence_forward(params, x, eps, switch=1.0, *,
                         tm_cap=512, tk_cap=512, tn_cap=1024):
    """Pallas TPU implementation of DeepSequence.forward (eq_samples=iw_samples=1)."""
    B, S, A = x.shape
    H = params["enc_w1"].shape[1]
    L = params["enc_wmu"].shape[1]
    assert A <= 128

    bf16 = jnp.bfloat16
    f32 = jnp.float32

    # ---- padded sizes & tiles ------------------------------------------------
    A_pad = min(_next_pow2(A), 128)        # pow2 divisor of 128 -> groups never
    N_pad = S * A_pad                      #   straddle lane tiles / column tiles
    L_pad = _round_up(L, 128)              # lane-aligned latent sections

    tm = min(tm_cap, _round_up(B, 8))      # big batch tile: weights streamed
    B_pad = _round_up(B, tm)               #   once per tm rows (HBM-bound win)

    tk = max(128, min(tk_cap, _round_up(N_pad, 128)))   # encoder reduction tile
    K_pad = _round_up(N_pad, tk)

    tn = max(128, min(tn_cap, _round_up(N_pad, 128)))   # decoder column tile
    N_out = _round_up(N_pad, tn)           # tn % 128 == 0 and tn % A_pad == 0
    n_nt = N_out // tn
    P = tn // A_pad                        # sequence positions per column tile

    # ---- operand prep (padding / casts / packing; tiny XLA ops, jit-fused) ---
    x_p = _pad_to(x, (B_pad, S, A_pad)).reshape(B_pad, N_pad)
    x_p = _pad_to(x_p, (B_pad, K_pad)).astype(bf16)
    eps_p = _pad_to(eps, (B_pad, L_pad)).astype(f32)

    enc_w1 = _pad_to(params["enc_w1"].reshape(S, A, H), (S, A_pad, H))
    enc_w1 = _pad_to(enc_w1.reshape(N_pad, H), (K_pad, H)).astype(bf16)
    enc_b1 = params["enc_b1"].astype(f32)
    enc_wh = jnp.concatenate([_pad_to(params["enc_wmu"], (H, L_pad)),
                              _pad_to(params["enc_wlv"], (H, L_pad))],
                             axis=1).astype(bf16)
    enc_bh = jnp.concatenate([_pad_to(params["enc_bmu"], (1, L_pad)),
                              _pad_to(params["enc_blv"], (1, L_pad))],
                             axis=1).astype(f32)

    dec_w1 = _pad_to(params["dec_w1"], (L_pad, H)).astype(bf16)
    dec_b1 = params["dec_b1"].astype(f32)

    def _pad_cols(w, rows):
        w = _pad_to(w.reshape(rows, S, A), (rows, S, A_pad)).reshape(rows, N_pad)
        return _pad_to(w, (rows, N_out))

    # Pack the two decoder heads per N-tile: tile n of the packed weight holds
    # [W_mean cols of tile n | W_var cols of tile n], so every grid step does a
    # single (H, 2*tn) matmul that reuses h.
    wm = _pad_cols(params["dec_wm"], H).reshape(H, n_nt, tn)
    wv = _pad_cols(params["dec_wv"], H).reshape(H, n_nt, tn)
    dec_wh = jnp.concatenate([wm, wv], axis=2).reshape(H, 2 * N_out).astype(bf16)
    bm = _pad_cols(params["dec_bm"], 1).reshape(1, n_nt, tn)
    bv = _pad_cols(params["dec_bv"], 1).reshape(1, n_nt, tn)
    dec_bh = jnp.concatenate([bm, bv], axis=2).reshape(1, 2 * N_out).astype(f32)

    # Rectangular 0/1 softmax matrices (values exact in bf16):
    #   gsum (tn, P): column j contributes to position j // A_pad, but only if
    #                 it is a real (non-padded) alphabet slot.
    #   bcast (P, tn): broadcast each position's reciprocal back to its columns.
    col = jnp.arange(tn, dtype=jnp.int32)
    pos = col // A_pad
    slot = col % A_pad
    p_idx = jnp.arange(P, dtype=jnp.int32)
    gsum = ((pos[:, None] == p_idx[None, :]) & (slot[:, None] < A)).astype(bf16)
    bcast = (p_idx[:, None] == pos[None, :]).astype(bf16)

    switch_arr = jnp.full((1, 1), switch, dtype=f32)

    # VMEM budget: ~3/4 of physical capacity (128 MiB on v5e/v6e, 64 MiB on v7x).
    try:
        vmem_limit = int(pltpu.get_tpu_info().vmem_capacity_bytes) * 3 // 4
    except Exception:
        vmem_limit = 48 * 1024 * 1024

    # ---- fused encoder + reparameterize + KL --------------------------------
    enc_out = pl.pallas_call(
        functools.partial(_encoder_kernel, L),
        grid=(B_pad // tm, K_pad // tk),
        in_specs=[
            pl.BlockSpec((tm, tk), lambda m, k: (m, k)),        # x        (bf16)
            pl.BlockSpec((tk, H), lambda m, k: (k, 0)),         # enc_w1   (bf16)
            pl.BlockSpec((1, H), lambda m, k: (0, 0)),          # enc_b1
            pl.BlockSpec((H, 2 * L_pad), lambda m, k: (0, 0)),  # [Wmu|Wlv](bf16)
            pl.BlockSpec((1, 2 * L_pad), lambda m, k: (0, 0)),  # [bmu|blv]
            pl.BlockSpec((tm, L_pad), lambda m, k: (m, 0)),     # eps
        ],
        out_specs=pl.BlockSpec((tm, 4 * L_pad), lambda m, k: (m, 0)),
        out_shape=jax.ShapeDtypeStruct((B_pad, 4 * L_pad), f32),
        scratch_shapes=[pltpu.VMEM((tm, H), f32)],
        compiler_params=pltpu.CompilerParams(
            dimension_semantics=("parallel", "arbitrary"),
            vmem_limit_bytes=vmem_limit),
    )(x_p, enc_w1, enc_b1, enc_wh, enc_bh, eps_p)

    # ---- fused decoder + per-position softmax + variance switch blend -------
    xmean_p, xvar_p = pl.pallas_call(
        _decoder_kernel,
        grid=(B_pad // tm, n_nt),
        in_specs=[
            pl.BlockSpec(memory_space=pltpu.MemorySpace.SMEM),  # switch scalar
            pl.BlockSpec((tm, L_pad), lambda m, n: (m, 2)),     # z slab section
            pl.BlockSpec((L_pad, H), lambda m, n: (0, 0)),      # dec_w1   (bf16)
            pl.BlockSpec((1, H), lambda m, n: (0, 0)),          # dec_b1
            pl.BlockSpec((H, 2 * tn), lambda m, n: (0, n)),     # packed head W
            pl.BlockSpec((1, 2 * tn), lambda m, n: (0, n)),     # packed head b
            pl.BlockSpec((tn, P), lambda m, n: (0, 0)),         # group-sum mat
            pl.BlockSpec((P, tn), lambda m, n: (0, 0)),         # broadcast mat
        ],
        out_specs=(
            pl.BlockSpec((tm, tn), lambda m, n: (m, n)),        # x_mean
            pl.BlockSpec((tm, tn), lambda m, n: (m, n)),        # x_var
        ),
        out_shape=(
            jax.ShapeDtypeStruct((B_pad, N_out), f32),
            jax.ShapeDtypeStruct((B_pad, N_out), f32),
        ),
        scratch_shapes=[pltpu.VMEM((tm, H), bf16)],              # cached h
        compiler_params=pltpu.CompilerParams(
            dimension_semantics=("parallel", "arbitrary"),
            vmem_limit_bytes=vmem_limit),
    )(switch_arr, enc_out, dec_w1, dec_b1, dec_wh, dec_bh, gsum, bcast)

    # ---- glue (tiny): unpack slab, unpad, finish the KL mean ----------------
    mu = enc_out[:B, 0 * L_pad:0 * L_pad + L]
    var = enc_out[:B, 1 * L_pad:1 * L_pad + L]
    z = enc_out[:B, 2 * L_pad:2 * L_pad + L]
    kld = jnp.sum(enc_out[:B, 3 * L_pad]) / (B * L)
    x_mean = xmean_p[:B, :N_pad].reshape(B, S, A_pad)[:, :, :A]
    x_var = xvar_p[:B, :N_pad].reshape(B, S, A_pad)[:, :, :A]
    return x_mean, x_var, z, mu, var, kld


# --------------------------- pure-JAX reference -------------------------------


def _reference_forward(params, x, eps, switch=1.0):
    B, S, A = x.shape
    xf = x.reshape(B, S * A)
    h = jnp.maximum(xf @ params["enc_w1"] + params["enc_b1"], 0.0)
    mu = h @ params["enc_wmu"] + params["enc_bmu"]
    var = jax.nn.softplus(h @ params["enc_wlv"] + params["enc_blv"])
    z = mu + jnp.sqrt(var) * eps
    hd = jnp.maximum(z @ params["dec_w1"] + params["dec_b1"], 0.0)
    logits = (hd @ params["dec_wm"] + params["dec_bm"]).reshape(B, S, A)
    x_mean = jax.nn.softmax(logits, axis=-1)
    x_var = jax.nn.softplus(hd @ params["dec_wv"] + params["dec_bv"]).reshape(B, S, A)
    x_var = switch * x_var + (1.0 - switch) * 0.02 ** 2
    diff = -0.5 * z ** 2 + 0.5 * var + 0.5 * jnp.exp(-var) * (z - mu) ** 2
    return x_mean, x_var, z, mu, var, jnp.mean(diff)


# ------------------------------- main ------------------------------------------


if __name__ == "__main__":
    # Small shapes, but picked (with reduced tile caps) so that every grid axis
    # has >1 tile: 2 batch tiles, 2 encoder K tiles, 2 decoder column tiles.
    B, S, A = 12, 32, 5        # batch, sequence length, alphabet size
    HIDDEN, LATENT = 32, 6

    key = jax.random.PRNGKey(0)
    k_par, k_seq, k_eps = jax.random.split(key, 3)

    params = init_params(k_par, S, A, HIDDEN, LATENT)

    # one-hot protein-like sequences, (B, S, A) float32
    tokens = jax.random.randint(k_seq, (B, S), 0, A)
    x = jax.nn.one_hot(tokens, A, dtype=jnp.float32)

    # reparameterization noise (eq_samples = iw_samples = 1)
    eps = jax.random.normal(k_eps, (B, LATENT), dtype=jnp.float32)

    # Small tile caps only to exercise the multi-tile paths at toy shapes;
    # the defaults (512/512/1024) are the production tiles.
    fwd = jax.jit(functools.partial(deepsequence_forward,
                                    tm_cap=8, tk_cap=128, tn_cap=128))
    out = fwd(params, x, eps, 1.0)
    jax.block_until_ready(out)
    x_mean, x_var, z, mu, var, kld = out

    assert x_mean.shape == (B, S, A) and x_var.shape == (B, S, A)
    assert z.shape == (B, LATENT) and mu.shape == (B, LATENT)
    assert var.shape == (B, LATENT) and kld.shape == ()
    # Softmax rows sum to 1 up to one bf16 rounding of the per-position
    # reciprocal (worst case ~2^-8 ~= 4e-3).
    assert jnp.allclose(jnp.sum(x_mean, axis=-1), 1.0, atol=1e-2)
    assert bool(jnp.all(x_var > 0.0)) and bool(jnp.isfinite(kld))

    # cross-check against a pure-JAX reference (bf16 matmuls -> loose tolerance)
    ref = _reference_forward(params, x, eps, 1.0)
    for name, got, want in zip(("x_mean", "x_var", "z", "mu", "var", "kld"),
                               out, ref):
        assert jnp.allclose(got, want, atol=5e-2, rtol=5e-2), name

    print("KERNEL_OK")
</pallas_src>

<mosaic_0001>
module attributes {stable_mosaic.version = 11 : i64} {
  func.func @_encoder_kernel(%arg0: i32, %arg1: i32, %arg2: memref<8x128xbf16, #tpu.memory_space<vmem>>, %arg3: memref<128x32xbf16, #tpu.memory_space<vmem>>, %arg4: memref<1x32xf32, #tpu.memory_space<vmem>>, %arg5: memref<32x256xbf16, #tpu.memory_space<vmem>>, %arg6: memref<1x256xf32, #tpu.memory_space<vmem>>, %arg7: memref<8x128xf32, #tpu.memory_space<vmem>>, %arg8: memref<8x512xf32, #tpu.memory_space<vmem>>, %arg9: memref<8x32xf32, #tpu.memory_space<vmem>>) attributes {dimension_semantics = [#tpu.dimension_semantics<parallel>, #tpu.dimension_semantics<arbitrary>], iteration_bounds = array<i64: 2, 2>, scalar_prefetch = 0 : i64, scratch_operands = 1 : i64, tpu.core_type = #tpu.core_type<tc>, window_params = [{transform_indices = @transform_0, window_bounds = array<i64: 8, 128>}, {transform_indices = @transform_1, window_bounds = array<i64: 128, 32>}, {pipeline_mode = #tpu.pipeline_mode<synchronous>, transform_indices = @transform_2, window_bounds = array<i64: 1, 32>}, {pipeline_mode = #tpu.pipeline_mode<synchronous>, transform_indices = @transform_3, window_bounds = array<i64: 32, 256>}, {pipeline_mode = #tpu.pipeline_mode<synchronous>, transform_indices = @transform_4, window_bounds = array<i64: 1, 256>}, {transform_indices = @transform_5, window_bounds = array<i64: 8, 128>}, {transform_indices = @transform_6, window_bounds = array<i64: 8, 512>}]} {
    %c0_i32 = arith.constant 0 : i32
    %0 = arith.cmpi eq, %arg1, %c0_i32 : i32
    %1 = arith.extui %0 : i1 to i32
    %c0_i32_0 = arith.constant 0 : i32
    %2 = arith.cmpi ne, %1, %c0_i32_0 : i32
    scf.if %2 {
      %cst_9 = arith.constant 0.000000e+00 : f32
      %12 = vector.broadcast %cst_9 : f32 to vector<8x32xf32>
      %c0_10 = arith.constant 0 : index
      %c0_11 = arith.constant 0 : index
      %13 = vector.load %arg9[%c0_10, %c0_11] : memref<8x32xf32, #tpu.memory_space<vmem>>, vector<8x32xf32>
      tpu.vector_store %arg9[%c0_10, %c0_11], %12 {strides = array<i32>} : memref<8x32xf32, #tpu.memory_space<vmem>>, vector<8x32xf32>,
    } else {
    }
    %c0 = arith.constant 0 : index
    %c0_1 = arith.constant 0 : index
    %3 = vector.load %arg9[%c0, %c0_1] : memref<8x32xf32, #tpu.memory_space<vmem>>, vector<8x32xf32>
    %c0_2 = arith.constant 0 : index
    %c0_3 = arith.constant 0 : index
    %4 = vector.load %arg2[%c0_2, %c0_3] : memref<8x128xbf16, #tpu.memory_space<vmem>>, vector<8x128xbf16>
    %c0_4 = arith.constant 0 : index
    %c0_5 = arith.constant 0 : index
    %5 = vector.load %arg3[%c0_4, %c0_5] : memref<128x32xbf16, #tpu.memory_space<vmem>>, vector<128x32xbf16>
    %cst = arith.constant dense<0.000000e+00> : vector<8x32xf32>
    %6 = tpu.matmul %4, %5, %cst {dimension_numbers = #tpu.dot_dimension_numbers<[1], [0], [0], [1], [0, 0, 1, 1], [], []>} : vector<8x128xbf16>, vector<128x32xbf16>, vector<8x32xf32> -> vector<8x32xf32>
    %7 = arith.addf %3, %6 : vector<8x32xf32>
    %c0_6 = arith.constant 0 : index
    %c0_7 = arith.constant 0 : index
    %8 = vector.load %arg9[%c0_6, %c0_7] : memref<8x32xf32, #tpu.memory_space<vmem>>, vector<8x32xf32>
    tpu.vector_store %arg9[%c0_6, %c0_7], %7 {strides = array<i32>} : memref<8x32xf32, #tpu.memory_space<vmem>>, vector<8x32xf32>,
    %c1_i32 = arith.constant 1 : i32
    %9 = arith.cmpi eq, %arg1, %c1_i32 : i32
    %10 = arith.extui %9 : i1 to i32
    %c0_i32_8 = arith.constant 0 : i32
    %11 = arith.cmpi ne, %10, %c0_i32_8 : i32
    scf.if %11 {
      %c0_9 = arith.constant 0 : index
      %c0_10 = arith.constant 0 : index
      %12 = vector.load %arg9[%c0_9, %c0_10] : memref<8x32xf32, #tpu.memory_space<vmem>>, vector<8x32xf32>
      %c0_11 = arith.constant 0 : index
      %c0_12 = arith.constant 0 : index
      %13 = vector.load %arg4[%c0_11, %c0_12] : memref<1x32xf32, #tpu.memory_space<vmem>>, vector<1x32xf32>
      %14 = vector.broadcast %13 : vector<1x32xf32> to vector<8x32xf32>
      %15 = arith.addf %12, %14 : vector<8x32xf32>
      %cst_13 = arith.constant 0.000000e+00 : f32
      %16 = vector.broadcast %cst_13 : f32 to vector<8x32xf32>
      %17 = arith.maximumf %15, %16 : vector<8x32xf32>
      %18 = arith.truncf %17 : vector<8x32xf32> to vector<8x32xbf16>
      %c0_14 = arith.constant 0 : index
      %c0_15 = arith.constant 0 : index
      %19 = vector.load %arg5[%c0_14, %c0_15] : memref<32x256xbf16, #tpu.memory_space<vmem>>, vector<32x256xbf16>
      %cst_16 = arith.constant dense<0.000000e+00> : vector<8x256xf32>
      %20 = tpu.matmul %18, %19, %cst_16 {dimension_numbers = #tpu.dot_dimension_numbers<[1], [0], [0], [1], [0, 0, 1, 1], [], []>} : vector<8x32xbf16>, vector<32x256xbf16>, vector<8x256xf32> -> vector<8x256xf32>
      %c0_17 = arith.constant 0 : index
      %c0_18 = arith.constant 0 : index
      %21 = vector.load %arg6[%c0_17, %c0_18] : memref<1x256xf32, #tpu.memory_space<vmem>>, vector<1x256xf32>
      %22 = vector.broadcast %21 : vector<1x256xf32> to vector<8x256xf32>
      %23 = arith.addf %20, %22 : vector<8x256xf32>
      %24 = vector.extract_strided_slice %23 {offsets = [0, 0], sizes = [8, 128], strides = [1, 1]} : vector<8x256xf32> to vector<8x128xf32>
      %25 = vector.extract_strided_slice %23 {offsets = [0, 128], sizes = [8, 128], strides = [1, 1]} : vector<8x256xf32> to vector<8x128xf32>
      %cst_19 = arith.constant 0.000000e+00 : f32
      %26 = vector.broadcast %cst_19 : f32 to vector<8x128xf32>
      %27 = arith.maximumf %25, %26 : vector<8x128xf32>
      %28 = math.absf %25 : vector<8x128xf32>
      %cst_20 = arith.constant 0.000000e+00 : f32
      %29 = vector.broadcast %cst_20 : f32 to vector<8x128xf32>
      %30 = arith.subf %29, %28 : vector<8x128xf32>
      %31 = math.exp %30 : vector<8x128xf32>
      %cst_21 = arith.constant 1.000000e+00 : f32
      %32 = vector.broadcast %cst_21 : f32 to vector<8x128xf32>
      %33 = arith.addf %32, %31 : vector<8x128xf32>
      %34 = math.log %33 : vector<8x128xf32>
      %35 = arith.addf %27, %34 : vector<8x128xf32>
      %36 = math.sqrt %35 : vector<8x128xf32>
      %c0_22 = arith.constant 0 : index
      %c0_23 = arith.constant 0 : index
      %37 = vector.load %arg7[%c0_22, %c0_23] : memref<8x128xf32, #tpu.memory_space<vmem>>, vector<8x128xf32>
      %38 = arith.mulf %36, %37 : vector<8x128xf32>
      %39 = arith.addf %24, %38 : vector<8x128xf32>
      %40 = tpu.iota {dimensions = array<i32: 1>} : vector<8x128xi32>
      %c6_i32 = arith.constant 6 : i32
      %41 = vector.broadcast %c6_i32 : i32 to vector<8x128xi32>
      %42 = arith.cmpi slt, %40, %41 : vector<8x128xi32>
      %43 = arith.extui %42 : vector<8x128xi1> to vector<8x128xi32>
      %44 = arith.sitofp %43 : vector<8x128xi32> to vector<8x128xf32>
      %cst_24 = arith.constant -5.000000e-01 : f32
      %45 = vector.broadcast %cst_24 : f32 to vector<8x128xf32>
      %46 = arith.mulf %45, %39 : vector<8x128xf32>
      %47 = arith.mulf %46, %39 : vector<8x128xf32>
      %cst_25 = arith.constant 5.000000e-01 : f32
      %48 = vector.broadcast %cst_25 : f32 to vector<8x128xf32>
      %49 = arith.mulf %48, %35 : vector<8x128xf32>
      %50 = arith.addf %47, %49 : vector<8x128xf32>
      %cst_26 = arith.constant 0.000000e+00 : f32
      %51 = vector.broadcast %cst_26 : f32 to vector<8x128xf32>
      %52 = arith.subf %51, %35 : vector<8x128xf32>
      %53 = math.exp %52 : vector<8x128xf32>
      %cst_27 = arith.constant 5.000000e-01 : f32
      %54 = vector.broadcast %cst_27 : f32 to vector<8x128xf32>
      %55 = arith.mulf %54, %53 : vector<8x128xf32>
      %56 = arith.subf %39, %24 : vector<8x128xf32>
      %57 = arith.mulf %56, %56 : vector<8x128xf32>
      %58 = arith.mulf %55, %57 : vector<8x128xf32>
      %59 = arith.addf %50, %58 : vector<8x128xf32>
      %60 = arith.mulf %59, %44 : vector<8x128xf32>
      %cst_28 = arith.constant dense<0.000000e+00> : vector<8xf32>
      %61 = vector.multi_reduction <add>, %60, %cst_28 [1] : vector<8x128xf32> to vector<8xf32>
      %62 = vector.shape_cast %61 : vector<8xf32> to vector<8x1xf32>
      %c0_29 = arith.constant 0 : index
      %c0_30 = arith.constant 0 : index
      %63 = vector.load %arg8[%c0_29, %c0_30] : memref<8x512xf32, #tpu.memory_space<vmem>>, vector<8x128xf32>
      tpu.vector_store %arg8[%c0_29, %c0_30], %24 {strides = array<i32>} : memref<8x512xf32, #tpu.memory_space<vmem>>, vector<8x128xf32>,
      %c0_31 = arith.constant 0 : index
      %c128 = arith.constant 128 : index
      %64 = vector.load %arg8[%c0_31, %c128] : memref<8x512xf32, #tpu.memory_space<vmem>>, vector<8x128xf32>
      tpu.vector_store %arg8[%c0_31, %c128], %35 {strides = array<i32>} : memref<8x512xf32, #tpu.memory_space<vmem>>, vector<8x128xf32>,
      %c0_32 = arith.constant 0 : index
      %c256 = arith.constant 256 : index
      %65 = vector.load %arg8[%c0_32, %c256] : memref<8x512xf32, #tpu.memory_space<vmem>>, vector<8x128xf32>
      tpu.vector_store %arg8[%c0_32, %c256], %39 {strides = array<i32>} : memref<8x512xf32, #tpu.memory_space<vmem>>, vector<8x128xf32>,
      %66 = vector.shape_cast %62 : vector<8x1xf32> to vector<8x1xf32>
      %67 = vector.broadcast %66 : vector<8x1xf32> to vector<8x128xf32>
      %c0_33 = arith.constant 0 : index
      %c384 = arith.constant 384 : index
      %68 = vector.load %arg8[%c0_33, %c384] : memref<8x512xf32, #tpu.memory_space<vmem>>, vector<8x128xf32>
      tpu.vector_store %arg8[%c0_33, %c384], %67 {strides = array<i32>} : memref<8x512xf32, #tpu.memory_space<vmem>>, vector<8x128xf32>,
    } else {
    }
    return
  }
  func.func @transform_0(%arg0: i32, %arg1: i32) -> (i32, i32) {
    %c0_i32 = arith.constant 0 : i32
    return %arg0, %arg1 : i32, i32
  }
  func.func @transform_1(%arg0: i32, %arg1: i32) -> (i32, i32) {
    %c0_i32 = arith.constant 0 : i32
    %c0_i32_0 = arith.constant 0 : i32
    return %arg1, %c0_i32 : i32, i32
  }
  func.func @transform_2(%arg0: i32, %arg1: i32) -> (i32, i32) {
    %c0_i32 = arith.constant 0 : i32
    %c0_i32_0 = arith.constant 0 : i32
    %c0_i32_1 = arith.constant 0 : i32
    return %c0_i32, %c0_i32_0 : i32, i32
  }
  func.func @transform_3(%arg0: i32, %arg1: i32) -> (i32, i32) {
    %c0_i32 = arith.constant 0 : i32
    %c0_i32_0 = arith.constant 0 : i32
    %c0_i32_1 = arith.constant 0 : i32
    return %c0_i32, %c0_i32_0 : i32, i32
  }
  func.func @transform_4(%arg0: i32, %arg1: i32) -> (i32, i32) {
    %c0_i32 = arith.constant 0 : i32
    %c0_i32_0 = arith.constant 0 : i32
    %c0_i32_1 = arith.constant 0 : i32
    return %c0_i32, %c0_i32_0 : i32, i32
  }
  func.func @transform_5(%arg0: i32, %arg1: i32) -> (i32, i32) {
    %c0_i32 = arith.constant 0 : i32
    %c0_i32_0 = arith.constant 0 : i32
    return %arg0, %c0_i32 : i32, i32
  }
  func.func @transform_6(%arg0: i32, %arg1: i32) -> (i32, i32) {
    %c0_i32 = arith.constant 0 : i32
    %c0_i32_0 = arith.constant 0 : i32
    return %arg0, %c0_i32 : i32, i32
  }
}

module attributes {stable_mosaic.version = 11 : i64} {
  func.func @_decoder_kernel(%arg0: i32, %arg1: i32, %arg2: memref<1x1xf32, #tpu.memory_space<smem>>, %arg3: memref<8x128xf32, #tpu.memory_space<vmem>>, %arg4: memref<128x32xbf16, #tpu.memory_space<vmem>>, %arg5: memref<1x32xf32, #tpu.memory_space<vmem>>, %arg6: memref<32x256xbf16, #tpu.memory_space<vmem>>, %arg7: memref<1x256xf32, #tpu.memory_space<vmem>>, %arg8: memref<128x16xbf16, #tpu.memory_space<vmem>>, %arg9: memref<16x128xbf16, #tpu.memory_space<vmem>>, %arg10: memref<8x128xf32, #tpu.memory_space<vmem>>, %arg11: memref<8x128xf32, #tpu.memory_space<vmem>>, %arg12: memref<8x32xbf16, #tpu.memory_space<vmem>>) attributes {dimension_semantics = [#tpu.dimension_semantics<parallel>, #tpu.dimension_semantics<arbitrary>], iteration_bounds = array<i64: 2, 2>, scalar_prefetch = 0 : i64, scratch_operands = 1 : i64, tpu.core_type = #tpu.core_type<tc>, window_params = [{transform_indices = @transform_0, window_bounds = array<i64: 1, 1>}, {transform_indices = @transform_1, window_bounds = array<i64: 8, 128>}, {pipeline_mode = #tpu.pipeline_mode<synchronous>, transform_indices = @transform_2, window_bounds = array<i64: 128, 32>}, {pipeline_mode = #tpu.pipeline_mode<synchronous>, transform_indices = @transform_3, window_bounds = array<i64: 1, 32>}, {transform_indices = @transform_4, window_bounds = array<i64: 32, 256>}, {transform_indices = @transform_5, window_bounds = array<i64: 1, 256>}, {pipeline_mode = #tpu.pipeline_mode<synchronous>, transform_indices = @transform_6, window_bounds = array<i64: 128, 16>}, {pipeline_mode = #tpu.pipeline_mode<synchronous>, transform_indices = @transform_7, window_bounds = array<i64: 16, 128>}, {transform_indices = @transform_8, window_bounds = array<i64: 8, 128>}, {transform_indices = @transform_9, window_bounds = array<i64: 8, 128>}]} {
    %c0_i32 = arith.constant 0 : i32
    %0 = arith.cmpi eq, %arg1, %c0_i32 : i32
    %1 = arith.extui %0 : i1 to i32
    %c0_i32_0 = arith.constant 0 : i32
    %2 = arith.cmpi ne, %1, %c0_i32_0 : i32
    scf.if %2 {
      %c0_26 = arith.constant 0 : index
      %c0_27 = arith.constant 0 : index
      %47 = vector.load %arg3[%c0_26, %c0_27] : memref<8x128xf32, #tpu.memory_space<vmem>>, vector<8x128xf32>
      %48 = arith.truncf %47 : vector<8x128xf32> to vector<8x128xbf16>
      %c0_28 = arith.constant 0 : index
      %c0_29 = arith.constant 0 : index
      %49 = vector.load %arg4[%c0_28, %c0_29] : memref<128x32xbf16, #tpu.memory_space<vmem>>, vector<128x32xbf16>
      %cst_30 = arith.constant dense<0.000000e+00> : vector<8x32xf32>
      %50 = tpu.matmul %48, %49, %cst_30 {dimension_numbers = #tpu.dot_dimension_numbers<[1], [0], [0], [1], [0, 0, 1, 1], [], []>} : vector<8x128xbf16>, vector<128x32xbf16>, vector<8x32xf32> -> vector<8x32xf32>
      %c0_31 = arith.constant 0 : index
      %c0_32 = arith.constant 0 : index
      %51 = vector.load %arg5[%c0_31, %c0_32] : memref<1x32xf32, #tpu.memory_space<vmem>>, vector<1x32xf32>
      %52 = vector.broadcast %51 : vector<1x32xf32> to vector<8x32xf32>
      %53 = arith.addf %50, %52 : vector<8x32xf32>
      %cst_33 = arith.constant 0.000000e+00 : f32
      %54 = vector.broadcast %cst_33 : f32 to vector<8x32xf32>
      %55 = arith.maximumf %53, %54 : vector<8x32xf32>
      %56 = arith.truncf %55 : vector<8x32xf32> to vector<8x32xbf16>
      %c0_34 = arith.constant 0 : index
      %c0_35 = arith.constant 0 : index
      %57 = vector.load %arg12[%c0_34, %c0_35] : memref<8x32xbf16, #tpu.memory_space<vmem>>, vector<8x32xbf16>
      tpu.vector_store %arg12[%c0_34, %c0_35], %56 {strides = array<i32>} : memref<8x32xbf16, #tpu.memory_space<vmem>>, vector<8x32xbf16>,
    } else {
    }
    %c0 = arith.constant 0 : index
    %c0_1 = arith.constant 0 : index
    %3 = vector.load %arg12[%c0, %c0_1] : memref<8x32xbf16, #tpu.memory_space<vmem>>, vector<8x32xbf16>
    %c0_2 = arith.constant 0 : index
    %c0_3 = arith.constant 0 : index
    %4 = vector.load %arg6[%c0_2, %c0_3] : memref<32x256xbf16, #tpu.memory_space<vmem>>, vector<32x256xbf16>
    %cst = arith.constant dense<0.000000e+00> : vector<8x256xf32>
    %5 = tpu.matmul %3, %4, %cst {dimension_numbers = #tpu.dot_dimension_numbers<[1], [0], [0], [1], [0, 0, 1, 1], [], []>} : vector<8x32xbf16>, vector<32x256xbf16>, vector<8x256xf32> -> vector<8x256xf32>
    %c0_4 = arith.constant 0 : index
    %c0_5 = arith.constant 0 : index
    %6 = vector.load %arg7[%c0_4, %c0_5] : memref<1x256xf32, #tpu.memory_space<vmem>>, vector<1x256xf32>
    %7 = vector.broadcast %6 : vector<1x256xf32> to vector<8x256xf32>
    %8 = arith.addf %5, %7 : vector<8x256xf32>
    %9 = vector.extract_strided_slice %8 {offsets = [0, 0], sizes = [8, 128], strides = [1, 1]} : vector<8x256xf32> to vector<8x128xf32>
    %10 = vector.extract_strided_slice %8 {offsets = [0, 128], sizes = [8, 128], strides = [1, 1]} : vector<8x256xf32> to vector<8x128xf32>
    %cst_6 = arith.constant dense<0xFF800000> : vector<8xf32>
    %11 = vector.multi_reduction <maximumf>, %9, %cst_6 [1] : vector<8x128xf32> to vector<8xf32>
    %12 = vector.shape_cast %11 : vector<8xf32> to vector<8x1xf32>
    %13 = vector.broadcast %12 : vector<8x1xf32> to vector<8x128xf32>
    %14 = arith.subf %9, %13 : vector<8x128xf32>
    %15 = math.exp %14 : vector<8x128xf32>
    %16 = arith.truncf %15 : vector<8x128xf32> to vector<8x128xbf16>
    %c0_7 = arith.constant 0 : index
    %c0_8 = arith.constant 0 : index
    %17 = vector.load %arg8[%c0_7, %c0_8] : memref<128x16xbf16, #tpu.memory_space<vmem>>, vector<128x16xbf16>
    %cst_9 = arith.constant dense<0.000000e+00> : vector<8x16xf32>
    %18 = tpu.matmul %16, %17, %cst_9 {dimension_numbers = #tpu.dot_dimension_numbers<[1], [0], [0], [1], [0, 0, 1, 1], [], []>} : vector<8x128xbf16>, vector<128x16xbf16>, vector<8x16xf32> -> vector<8x16xf32>
    %cst_10 = arith.constant 1.000000e-30 : f32
    %19 = vector.broadcast %cst_10 : f32 to vector<8x16xf32>
    %20 = arith.maximumf %18, %19 : vector<8x16xf32>
    %cst_11 = arith.constant 1.000000e+00 : f32
    %21 = vector.broadcast %cst_11 : f32 to vector<8x16xf32>
    %22 = arith.divf %21, %20 : vector<8x16xf32>
    %23 = arith.truncf %22 : vector<8x16xf32> to vector<8x16xbf16>
    %c0_12 = arith.constant 0 : index
    %c0_13 = arith.constant 0 : index
    %24 = vector.load %arg9[%c0_12, %c0_13] : memref<16x128xbf16, #tpu.memory_space<vmem>>, vector<16x128xbf16>
    %cst_14 = arith.constant dense<0.000000e+00> : vector<8x128xf32>
    %25 = tpu.matmul %23, %24, %cst_14 {dimension_numbers = #tpu.dot_dimension_numbers<[1], [0], [0], [1], [0, 0, 1, 1], [], []>} : vector<8x16xbf16>, vector<16x128xbf16>, vector<8x128xf32> -> vector<8x128xf32>
    %26 = arith.extf %16 : vector<8x128xbf16> to vector<8x128xf32>
    %27 = arith.mulf %26, %25 : vector<8x128xf32>
    %c0_15 = arith.constant 0 : index
    %c0_16 = arith.constant 0 : index
    %28 = vector.load %arg10[%c0_15, %c0_16] : memref<8x128xf32, #tpu.memory_space<vmem>>, vector<8x128xf32>
    tpu.vector_store %arg10[%c0_15, %c0_16], %27 {strides = array<i32>} : memref<8x128xf32, #tpu.memory_space<vmem>>, vector<8x128xf32>,
    %c0_17 = arith.constant 0 : index
    %c0_18 = arith.constant 0 : index
    %29 = memref.load %arg2[%c0_17, %c0_18] : memref<1x1xf32, #tpu.memory_space<smem>>
    %cst_19 = arith.constant 0.000000e+00 : f32
    %30 = vector.broadcast %cst_19 : f32 to vector<8x128xf32>
    %31 = arith.maximumf %10, %30 : vector<8x128xf32>
    %32 = math.absf %10 : vector<8x128xf32>
    %cst_20 = arith.constant 0.000000e+00 : f32
    %33 = vector.broadcast %cst_20 : f32 to vector<8x128xf32>
    %34 = arith.subf %33, %32 : vector<8x128xf32>
    %35 = math.exp %34 : vector<8x128xf32>
    %cst_21 = arith.constant 1.000000e+00 : f32
    %36 = vector.broadcast %cst_21 : f32 to vector<8x128xf32>
    %37 = arith.addf %36, %35 : vector<8x128xf32>
    %38 = math.log %37 : vector<8x128xf32>
    %39 = arith.addf %31, %38 : vector<8x128xf32>
    %40 = vector.broadcast %29 : f32 to vector<8x128xf32>
    %41 = arith.mulf %40, %39 : vector<8x128xf32>
    %cst_22 = arith.constant 1.000000e+00 : f32
    %42 = arith.subf %cst_22, %29 : f32
    %cst_23 = arith.constant 4.000000e-04 : f32
    %43 = arith.mulf %42, %cst_23 : f32
    %44 = vector.broadcast %43 : f32 to vector<8x128xf32>
    %45 = arith.addf %41, %44 : vector<8x128xf32>
    %c0_24 = arith.constant 0 : index
    %c0_25 = arith.constant 0 : index
    %46 = vector.load %arg11[%c0_24, %c0_25] : memref<8x128xf32, #tpu.memory_space<vmem>>, vector<8x128xf32>
    tpu.vector_store %arg11[%c0_24, %c0_25], %45 {strides = array<i32>} : memref<8x128xf32, #tpu.memory_space<vmem>>, vector<8x128xf32>,
    return
  }
  func.func @transform_0(%arg0: i32, %arg1: i32) -> (i32, i32) {
    %c0_i32 = arith.constant 0 : i32
    %c0_i32_0 = arith.constant 0 : i32
    %c0_i32_1 = arith.constant 0 : i32
    return %c0_i32, %c0_i32_0 : i32, i32
  }
  func.func @transform_1(%arg0: i32, %arg1: i32) -> (i32, i32) {
    %c2_i32 = arith.constant 2 : i32
    %c0_i32 = arith.constant 0 : i32
    return %arg0, %c2_i32 : i32, i32
  }
  func.func @transform_2(%arg0: i32, %arg1: i32) -> (i32, i32) {
    %c0_i32 = arith.constant 0 : i32
    %c0_i32_0 = arith.constant 0 : i32
    %c0_i32_1 = arith.constant 0 : i32
    return %c0_i32, %c0_i32_0 : i32, i32
  }
  func.func @transform_3(%arg0: i32, %arg1: i32) -> (i32, i32) {
    %c0_i32 = arith.constant 0 : i32
    %c0_i32_0 = arith.constant 0 : i32
    %c0_i32_1 = arith.constant 0 : i32
    return %c0_i32, %c0_i32_0 : i32, i32
  }
  func.func @transform_4(%arg0: i32, %arg1: i32) -> (i32, i32) {
    %c0_i32 = arith.constant 0 : i32
    %c0_i32_0 = arith.constant 0 : i32
    return %c0_i32, %arg1 : i32, i32
  }
  func.func @transform_5(%arg0: i32, %arg1: i32) -> (i32, i32) {
    %c0_i32 = arith.constant 0 : i32
    %c0_i32_0 = arith.constant 0 : i32
    return %c0_i32, %arg1 : i32, i32
  }
  func.func @transform_6(%arg0: i32, %arg1: i32) -> (i32, i32) {
    %c0_i32 = arith.constant 0 : i32
    %c0_i32_0 = arith.constant 0 : i32
    %c0_i32_1 = arith.constant 0 : i32
    return %c0_i32, %c0_i32_0 : i32, i32
  }
  func.func @transform_7(%arg0: i32, %arg1: i32) -> (i32, i32) {
    %c0_i32 = arith.constant 0 : i32
    %c0_i32_0 = arith.constant 0 : i32
    %c0_i32_1 = arith.constant 0 : i32
    return %c0_i32, %c0_i32_0 : i32, i32
  }
  func.func @transform_8(%arg0: i32, %arg1: i32) -> (i32, i32) {
    %c0_i32 = arith.constant 0 : i32
    return %arg0, %arg1 : i32, i32
  }
  func.func @transform_9(%arg0: i32, %arg1: i32) -> (i32, i32) {
    %c0_i32 = arith.constant 0 : i32
    return %arg0, %arg1 : i32, i32
  }
}

</mosaic_0001>

<bundles_post_ra>
// kernel: deepsequence_forward.2
= control target key start
LH: loop header
LB: loop body
LE: loop exit
PB: predicated region body
PF: predicated region fallthrough
CT: control target
= control target key end

     0   :  { %s872_s21 = smov 0   ;;  %s874_s22 = smov 0   ;;  %s978_s0 = inlined_call_operand.vmem [shape: bf16[16,256], index: 0, kind: input, shape index: {}]   ;;  %s979_s1 = inlined_call_operand.vmem [shape: bf16[256,32], index: 1, kind: input, shape index: {}]   ;;  %s980_s2 = inlined_call_operand.vmem [shape: f32[1,32], index: 2, kind: input, shape index: {}]   ;;  %s981_s3 = inlined_call_operand.vmem [shape: bf16[32,256], index: 3, kind: input, shape index: {}]   ;;  %s982_s4 = inlined_call_operand.vmem [shape: f32[1,256], index: 4, kind: input, shape index: {}]   ;;  %s983_s5 = inlined_call_operand.vmem [shape: f32[16,128], index: 5, kind: input, shape index: {}]   ;;  %s984_s6 = inlined_call_operand.vmem [shape: f32[16,512], index: 6, kind: output, shape index: {}]  }
   0x1   :  { %s876_s23 = smov 0   ;;  %s878_s24 = smov 0  }
   0x2   :  { %s880_s25 = smov 0  }
   0x3 LB: > { %s25_s26 = sadd.s32 1, %s822_s23  ;;  %s28_s27 = sadd.s32 1, %s826_s24  ;;  %s830_s25 = sphi %s880_s25, %s16_s25   ;;  %s826_s24 = sphi %s878_s24, %s988_s24   ;;  %s822_s23 = sphi %s876_s23, %s987_s23   ;;  %s818_s22 = sphi %s874_s22, %s986_s22   ;;  %s814_s21 = sphi %s872_s21, %s985_s21  }
   0x4   : > { %p26_p0 = scmp.ge.s32.totalorder %s25_s26, 2  ;;  %p668_p1 = scmp.ge.s32.totalorder %s830_s25, 1 }
   0x5   : > { %p249_p2 = scmp.lt.s32.totalorder %s830_s25, 5 }
   0x6   : > { %s990_s26 = smov (%p26_p0, %s25_s26), 0  ;;  %s992_s27 = smov (!%p26_p0, %s28_s27), %s826_s24 }
   0x7   : > { %p250_p3 = pnand %p668_p1, %p249_p2  ;;  %p30_p4 = scmp.ge.s32.totalorder %s992_s27, 2 }
   0x8   : > { %p291_p5 = scmp.lt.s32.totalorder (!%p250_p3), %s818_s22, 1  ;;  %p293_p6 = scmp.lt.s32.totalorder (!%p250_p3), %s814_s21, 1 }
   0x9   : > { %s994_s27 = smov (%p30_p4, %s992_s27), 0  ;;  %253 = sbr.rel (%p250_p3) target bundleno = 711 (0x2c7), region = 44 }
   0xa   : > { %s671_s28 = sshll.u32 (!%p250_p3), %s814_s21, 4  ;;  %p676_p8 = scmp.ne.s32.totalorder (!%p250_p3), %s814_s21, 0 }
   0xb   : > { %p300_p7 = scmp.lt.s32.totalorder (!%p250_p3), %s671_s28, 31 }
  0x10   : > { %s996_s22 = smov (!%p291_p5, %s818_s22), 1  ;;  %s998_s28 = smov (!%p300_p7, %s671_s28), 31 }
  0x11   : > { %s294_s29 = scalar_select %p293_p6, %s814_s21, 1 }
  0x12   : > { %s669_s30 = sshll.u32 %s996_s22, 1  ;;  %s673_s8 = sshll.u32 %s996_s22, 3  ;;  %vm319_vm0 = vcmask (!%p676_p8), 261120   ;;  %v832_v0 = vmov (!%p676_p8), 0.0  }
  0x13   : > { %s296_s7 = sadd.s32 %s669_s30, %s294_s29  ;;  %s910_s12 = scalar_lea.vmem %s983_s5, %s673_s8  ;;  %320 = vst.msk [vmem:[#allocation2] sm:$0xff] (!%p676_p8), %vm319_vm0, %v832_v0 }
  0x14   : > { %s670_s9 = sshll.u32 %s296_s7, 2  ;;  %s695_s16 = sshll.u32 %s996_s22, 5 }
  0x15   : > { %s915_s15 = scalar_lea.vmem %s978_s0, %s670_s9  ;;  %s920_s19 = scalar_lea.vmem %s984_s6, %s695_s16 }
  0x16   : > { %s672_s20 = sshll.u32 %s998_s28, 2  ;;  %318 = sbr.rel (%p676_p8) target bundleno = 29 (0x1d), region = 48 }
  0x17   : > { %s925_s7 = scalar_lea.vmem %s979_s1, %s672_s20 }
  0x1d PF: > { %v770_v1 = vld [vmem:[%s925_s7] sm:$0xff]   ;;  %v833_v2 = vmov 0.0   ;;  %v771_v3 = vld [vmem:[%s925_s7 + $0x8] sm:$0xff]   ;;  %vm834_vm1 = vmmov 0   ;;  %v772_v4 = vld [vmem:[%s925_s7 + $0x10] sm:$0xff]   ;;  %vm428_vm2 = vcmask 261120  }
  0x1e   : > { %705 = vmatprep.subr.bf16.mxu0 %v833_v2  ;;  %721 = vmatprep.mubr.msk.bf16.mxu0 %vm834_vm1, %v833_v2  ;;  %v773_v5 = vld [vmem:[%s925_s7 + $0x18] sm:$0xff]   ;;  %v774_v6 = vld [vmem:[%s925_s7 + $0x20] sm:$0xff]   ;;  %v775_v7 = vld [vmem:[%s925_s7 + $0x28] sm:$0xff]   ;;  %p685_p9 = scmp.ne.s32.totalorder %s814_s21, 1 }
  0x1f   : > { %706 = vmatpush3.bf16.msra.mxu0 %v770_v1  ;;  %v776_v8 = vld [vmem:[%s925_s7 + $0x30] sm:$0xff]   ;;  %v777_v9 = vld [vmem:[%s925_s7 + $0x38] sm:$0xff]   ;;  %v322_v10 = vld [vmem:[%s915_s15] sm:$0xf]  ;;  %v835_v19 = vmov (!%p685_p9), 0   ;;  %v451_v27 = vlaneseq (!%p685_p9) }
  0x20   : > { %707 = vmatprep.subr.bf16.mxu0 %v833_v2  ;;  %v321_v11 = vld [vmem:[#allocation2] sm:$0xff]  ;;  %v781_v20 = vld [vmem:[%s981_s3 + $0x14] ss:$8 sps:$4 sm:$0xff] (!%p685_p9)   ;;  %v783_v22 = vld [vmem:[%s981_s3 + $0x10] ss:$8 sps:$4 sm:$0xff] (!%p685_p9)  }
  0x21   : > { %v778_v17 = vld [vmem:[%s981_s3 + $0x4] ss:$8 sps:$4 sm:$0xff] (!%p685_p9)   ;;  %v780_v18 = vld [vmem:[%s981_s3] ss:$8 sps:$4 sm:$0xff] (!%p685_p9)   ;;  %v452_v28 = vshrl.u32 (!%p685_p9), %v451_v27, 7  ;;  %v545_v58 = vand.u32 (!%p685_p9), 127, %v451_v27 }
  0x22   : > { %v686_v23 = vld [vmem:[%s980_s2] ss:$0 sm:$0xff] (!%p685_p9) }
  0x23   : > { %708 = vmatpush3.bf16.msra.mxu0 %v771_v3  ;;  %v453_v29 = vsub.s32 (!%p685_p9), 0, %v452_v28  ;;  %v449_v30 = vld [vmem:[%s982_s4] sm:$0x3] (!%p685_p9)  ;;  %v457_v31 = vsub.s32 (!%p685_p9), 1, %v452_v28  ;;  %vm546_vm5 = vcmp.lt.s32.totalorder (!%p685_p9), %v545_v58, 6 }
  0x24   : > { %709 = vmatprep.subr.bf16.mxu0 %v833_v2  ;;  %v541_v54 = vld [vmem:[%s910_s12] sm:$0xff] (!%p685_p9) }
  0x25   : > { %v454_v32 = vrot.slane (!%p685_p9), %v449_v30, %v453_v29  ;;  %v458_v33 = vrot.slane (!%p685_p9), %v449_v30, %v457_v31 }
  0x27   : > { %710 = vmatpush3.bf16.msra.mxu0 %v772_v4 }
  0x28   : > { %711 = vmatprep.subr.bf16.mxu0 %v833_v2 }
  0x2b   : > { %712 = vmatpush3.bf16.msra.mxu0 %v773_v5  ;;  %v836_v5 = vmov (!%p685_p9), 0.0  }
  0x2c   : > { %713 = vmatprep.subr.bf16.mxu0 %v833_v2 }
  0x2f   : > { %714 = vmatpush3.bf16.msra.mxu0 %v774_v6  ;;  %v692_v6 = vsel (!%p685_p9), %vm546_vm5, 1.0, %v836_v5 }
  0x30   : > { %715 = vmatprep.subr.bf16.mxu0 %v833_v2 }
  0x33   : > { %716 = vmatpush3.bf16.msra.mxu0 %v775_v7 }
  0x34   : > { %717 = vmatprep.subr.bf16.mxu0 %v833_v2 }
  0x37   : > { %718 = vmatpush3.bf16.msra.mxu0 %v776_v8 }
  0x38   : > { %719 = vmatprep.subr.bf16.mxu0 %v833_v2 }
  0x3b   : > { %720 = vmatpush3.bf16.msra.mxu0 %v777_v9 }
  0x3c   : > { %484 = vmatprep.subr.bf16.mxu0 (!%p685_p9), %v778_v17 }
  0x3e   : > { %722 = vmatmul.mubr.bf16.vlgmr.msra.gmra.mrb[0].mxu0 %v322_v10 }
  0x3f   : > { %516 = vmatprep.mubr.bf16.mxu0 (!%p685_p9), %v835_v19  ;;  %485 = vmatpush1.bf16.msra.mxu0 (!%p685_p9), %v780_v18 }
  0x40   : > { %486 = vmatprep.subr.bf16.mxu0 (!%p685_p9), %v781_v20 }
  0x43   : > { %487 = vmatpush1.bf16.msra.mxu0 (!%p685_p9), %v783_v22 }
 0x10e   : > { %433 = sbr.rel (%p685_p9) target bundleno = 711 (0x2c7), region = 52 }
 0x111   : > { %v421_v12 = vpop.f32.mrb[0].mxu0 }
 0x112   : > { %v427_v13 = vadd.f32 %v421_v12, %v321_v11  ;;  %v723_v14 = vpop.f32.mrb[1].mxu0 }
 0x113   : > { %v424_v15 = vpop.f32.mrb[2].mxu0 }
 0x114   : > { %429 = vst.msk [vmem:[#allocation2] sm:$0xff] %vm428_vm2, %v427_v13  ;;  %v724_v16 = vpop.f32.mrb[3].mxu0 }
 0x11b   : > { %v434_v21 = vld [vmem:[#allocation2] sm:$0xff] }
 0x11c   : > { %v442_v24 = vadd.f32 %v686_v23, %v434_v21 }
 0x11e   : > { %v443_v25 = vmax.f32 %v442_v24, 0.0 }
 0x120   : > { %v444_v26 = vpack.c.bf16 %v443_v25, %v443_v25 }
 0x122   : > { %691 = vmatmul.mubr.msk.bf16.vlgmr.msra.gmra.mrb[0].mxu0 %vm428_vm2, %v444_v26 }
 0x1f5   : > { %v518_v34 = vpop.f32.mrb[0].mxu0 }
 0x1f6   : > { %v519_v35 = vadd.f32 %v518_v34, %v454_v32  ;;  %v520_v36 = vpop.f32.mrb[1].mxu0 }
 0x1f7   : > { %v521_v37 = vadd.f32 %v520_v36, %v458_v33  ;;  %v522_v38 = vpop.f32.mrb[2].mxu0 }
 0x1f8   : > { %564 = vst [vmem:[%s920_s19] sm:$0xff] %v519_v35  ;;  %v523_v39 = vpop.f32.mrb[3].mxu0 }
 0x1f9   : > { %v526_v40 = vand.u32 2147483647, %v521_v37  ;;  %v525_v46 = vmax.f32 %v521_v37, 0.0 }
 0x1fb   : > { %v527_v41 = vsub.f32 0.0, %v526_v40 }
 0x1fd   : > { %v528_v42 = vmul.f32 1.442695, %v527_v41 }
 0x1ff   : > { %784 = vpow2.f32 %v528_v42 }
 0x209   : > { %v785_v43 = vpop.eup %784 }
 0x20a   : > { %v530_v44 = vadd.f32 1.0, %v785_v43 }
 0x20c   : > { %786 = vlog2.f32 %v530_v44 }
 0x216   : > { %v787_v45 = vpop.eup %786 }
 0x217   : > { %v532_v47 = vmul.f32 0.6931472, %v787_v45 }
 0x219   : > { %v533_v48 = vadd.f32 %v532_v47, %v525_v46 }
 0x21b   : > { %565 = vst [vmem:[%s920_s19 + $0x8] sm:$0xff] %v533_v48  ;;  %788 = vrsqrt.f32 %v533_v48  ;;  %v553_v49 = vsub.f32 0.0, %v533_v48  ;;  %vm536_vm3 = vcmp.eq.f32.partialorder %v533_v48, inf  ;;  %v539_v53 = vand.u32 2147483648, %v533_v48 }
 0x21c   : > { %vm538_vm4 = vcmp.eq.f32.partialorder %v533_v48, 0.0  ;;  %v551_v0 = vmul.f32 0.5, %v533_v48 }
 0x21d   : > { %v554_v50 = vmul.f32 1.442695, %v553_v49 }
 0x21f   : > { %790 = vpow2.f32 %v554_v50 }
 0x225   : > { %v789_v51 = vpop.eup %788 }
 0x226   : > { %v535_v52 = vmul.f32 %v789_v51, %v533_v48 }
 0x228   : > { %v537_v55 = vsel %vm536_vm3, %v533_v48, %v535_v52 }
 0x229   : > { %v540_v56 = vsel %vm538_vm4, %v539_v53, %v537_v55  ;;  %v791_v60 = vpop.eup %790 }
 0x22a   : > { %v542_v57 = vmul.f32 %v541_v54, %v540_v56  ;;  %v556_v1 = vmul.f32 0.5, %v791_v60 }
 0x22c   : > { %v543_v59 = vadd.f32 %v542_v57, %v519_v35 }
 0x22e   : > { %v549_v61 = vmul.f32 -0.5, %v543_v59  ;;  %v557_v62 = vsub.f32 %v543_v59, %v519_v35  ;;  %566 = vst [vmem:[%s920_s19 + $0x10] sm:$0xff] %v543_v59 }
 0x230   : > { %v550_v63 = vmul.f32 %v549_v61, %v543_v59  ;;  %v558_v2 = vmul.f32 %v557_v62, %v557_v62 }
 0x232   : > { %v552_v3 = vadd.f32 %v551_v0, %v550_v63  ;;  %v559_v4 = vmul.f32 %v558_v2, %v556_v1 }
 0x234   : > { %v560_v7 = vadd.f32 %v559_v4, %v552_v3 }
 0x236   : > { %v561_v8 = vmul.f32 %v692_v6, %v560_v7 }
 0x238   : > { %562 = vadd.xlane.f32.xlu0 %v561_v8 }
 0x2c5   : > { %v563_v9 = vpop.xlane.xlu0 %562 }
 0x2c6   : > { %567 = vst [vmem:[%s920_s19 + $0x18] sm:$0xff] %v563_v9 }
 0x2c7 PF: > { %s16_s25 = sadd.s32 1, %s830_s25   ;;  %s985_s21 = smov %s822_s23 }
 0x2c8   : > { %p13_p10 = scmp.ge.s32.totalorder %s16_s25, 6   ;;  %s986_s22 = smov %s826_s24 }
 0x2c9   : > { %s987_s23 = smov %s990_s26  ;;  %s988_s24 = smov %s994_s27 }
 0x2ca   :  { %15 = sbr.rel (!%p13_p10) target bundleno = 3 (0x3), region = 88 }

// kernel: deepsequence_forward.3
= control target key start
LH: loop header
LB: loop body
LE: loop exit
PB: predicated region body
PF: predicated region fallthrough
CT: control target
= control target key end

     0   :  { %s1509_s0 = inlined_call_operand.<no memory space> [shape: f32[1,1], index: 0, kind: input, shape index: {}]   ;;  %s1510_s1 = inlined_call_operand.vmem [shape: f32[16,512], index: 1, kind: input, shape index: {}]   ;;  %s1511_s2 = inlined_call_operand.vmem [shape: bf16[128,32], index: 2, kind: input, shape index: {}]   ;;  %s1512_s3 = inlined_call_operand.vmem [shape: f32[1,32], index: 3, kind: input, shape index: {}]   ;;  %s1513_s4 = inlined_call_operand.vmem [shape: bf16[32,512], index: 4, kind: input, shape index: {}]   ;;  %s1514_s5 = inlined_call_operand.vmem [shape: f32[1,512], index: 5, kind: input, shape index: {}]   ;;  %s1515_s6 = inlined_call_operand.vmem [shape: bf16[128,16], index: 6, kind: input, shape index: {}]   ;;  %s1516_s7 = inlined_call_operand.vmem [shape: bf16[16,128], index: 7, kind: input, shape index: {}]   ;;  %s1517_s8 = inlined_call_operand.vmem [shape: f32[16,256], index: 8, kind: output, shape index: {0}]   ;;  %s1518_s9 = inlined_call_operand.vmem [shape: f32[16,256], index: 9, kind: output, shape index: {1}]  }
   0x1   :  { %1522 = sst [smem:[#allocation10_spill]] %s1513_s4 }
   0x2   :  { %15 = sst [smem:[#allocation3]] %s1509_s0 }
   0x3   :  { %s1333_s11 = smov 0   ;;  %s1335_s12 = smov 0  }
   0x4   :  { %s1337_s13 = smov 0   ;;  %s1339_s14 = smov 0  }
   0x5   :  { %s1341_s15 = smov 0   ;;  %s1343_s16 = smov 0  }
   0x6   :  { %s1345_s17 = smov 0  }
   0x7 LB: > { %1523 = sst [smem:[#allocation5_spill]] %s1265_s15  ;;  %s30_s0 = sadd.s32 1, %s1265_s15  ;;  %s1273_s17 = sphi %s1345_s17, %s21_s17   ;;  %s1269_s16 = sphi %s1343_s16, %s1533_s16   ;;  %s1265_s15 = sphi %s1341_s15, %s1532_s15   ;;  %s1261_s14 = sphi %s1339_s14, %s1531_s14   ;;  %s1257_s13 = sphi %s1337_s13, %s1530_s13   ;;  %s1253_s12 = sphi %s1335_s12, %s1535_s12   ;;  %s1249_s11 = sphi %s1333_s11, %s1534_s11  }
   0x8   : > { %1524 = sst [smem:[#allocation6_spill]] %s1269_s16  ;;  %s33_s18 = sadd.s32 1, %s1269_s16 }
   0x9   : > { %p31_p0 = scmp.ge.s32.totalorder %s30_s0, 2  ;;  %s129_s19 = sadd.s32 1, %s1253_s12 }
   0xa   : > { %p136_p1 = scmp.ne.s32.totalorder %s1253_s12, %s1249_s11  ;;  %p137_p2 = scmp.eq.s32.totalorder %s1273_s17, 0 }
   0xb   : > { %s1537_s0 = smov (%p31_p0, %s30_s0), 0  ;;  %s1539_s18 = smov (!%p31_p0, %s33_s18), %s1269_s16 }
   0xc   : > { %1525 = sst [smem:[#allocation7_spill]] %s1537_s0  ;;  %s126_s20 = ssub.s32 %s1265_s15, %s1537_s0 }
   0xd   : > { %p138_p3 = por %p137_p2, %p136_p1  ;;  %p35_p4 = scmp.ge.s32.totalorder %s1539_s18, 2 }
   0xe   : > { %p127_p5 = scmp.eq.s32.totalorder %s126_s20, 0  ;;  %p1018_p6 = scmp.ge.s32.totalorder %s1273_s17, 4 }
   0xf   : > { %s1541_s18 = smov (%p35_p4, %s1539_s18), 0 }
  0x10   : > { %1526 = sst [smem:[#allocation8_spill]] %s1541_s18  ;;  %301 = sbr.rel (%p1018_p6) target bundleno = 35 (0x23), region = 36 }
  0x11   : > { %s1382_s21 = scalar_select %p127_p5, %s1253_s12, %s129_s19  }
  0x13   : > { %1527 = sst [smem:[#allocation9_spill]] %s1382_s21 }
  0x17   : > { %313 = sbr.rel (!%p138_p3) target bundleno = 35 (0x23), region = 44  ;;  %s315_s22 = sand.u32 (%p138_p3), 1, %s1253_s12  }
  0x18   : > { %s1059_s23 = sshll.u32 (%p138_p3), %s1265_s15, 3  ;;  %s1019_s24 = sshll.u32 (%p138_p3), %s315_s22, 5 }
  0x19   : > { %s1528_s4 = sld [smem:[#allocation10_spill]] (%p138_p3)  ;;  %s317_s28 = scalar_lea.vmem (%p138_p3), [#allocation4], %s1019_s24 }
  0x1f   : > { %s320_s27 = scalar_lea.vmem %s1528_s4, %s1059_s23 }
  0x20   : > { %v354_v0 = vld [vmem:[%s320_s27] sm:$0xff]  ;;  %v356_v1 = vld [vmem:[%s320_s27 + $0x10] sm:$0xff] }
  0x21   : > { %v358_v2 = vld [vmem:[%s320_s27 + $0x20] sm:$0xff]  ;;  %355 = vst [vmem:[%s317_s28] sm:$0xff] %v354_v0  ;;  %357 = vst [vmem:[%s317_s28 + $0x8] sm:$0xff] %v356_v1  ;;  %v360_v3 = vld [vmem:[%s320_s27 + $0x30] sm:$0xff] }
  0x22   : > { %359 = vst [vmem:[%s317_s28 + $0x10] sm:$0xff] %v358_v2  ;;  %361 = vst [vmem:[%s317_s28 + $0x18] sm:$0xff] %v360_v3 }
  0x23 PF: > { %p1022_p7 = scmp.ge.s32.totalorder %s1273_s17, 1  ;;  %p374_p8 = scmp.lt.s32.totalorder %s1273_s17, 5 }
  0x25   : > { %p375_p9 = pnand %p1022_p7, %p374_p8 }
  0x26   : > { %s381_s29 = sand.u32 (!%p375_p9), 1, %s1249_s11   ;;  %p437_p10 = scmp.lt.s32.totalorder (!%p375_p9), %s1261_s14, 1 }
  0x27   : > { %378 = sbr.rel (%p375_p9) target bundleno = 1124 (0x464), region = 86  ;;  %s1023_s30 = sshll.u32 (!%p375_p9), %s381_s29, 5 }
  0x28   : > { %s1026_s10 = sshll.u32 (!%p375_p9), %s1257_s13, 1  ;;  %p451_p12 = scmp.lt.s32.totalorder (!%p375_p9), %s1257_s13, 1 }
  0x29   : > { %p445_p11 = scmp.lt.s32.totalorder (!%p375_p9), %s1026_s10, 3  ;;  %p1031_p13 = scmp.ne.s32.totalorder (!%p375_p9), %s1257_s13, 0 }
  0x2e   : > { %s1543_s14 = smov (!%p437_p10, %s1261_s14), 1  ;;  %s1545_s10 = smov (!%p445_p11, %s1026_s10), 3 }
  0x2f   : > { %s1060_s19 = sshll.u32 %s1543_s14, 5  ;;  %s447_s26 = scalar_lea.vmem %s1514_s5, %s1545_s10  ;;  %v1188_v4 = vld [vmem:[%s1511_s2] sm:$0xff] (!%p1031_p13)   ;;  %v1275_v5 = vmov (!%p1031_p13), 0.0   ;;  %v1189_v6 = vld [vmem:[%s1511_s2 + $0x8] sm:$0xff] (!%p1031_p13)   ;;  %vm1276_vm0 = vmmov (!%p1031_p13), 0   ;;  %v1190_v7 = vld [vmem:[%s1511_s2 + $0x10] sm:$0xff] (!%p1031_p13)  }
  0x30   : > { %s1402_s23 = scalar_lea.vmem %s1510_s1, %s1060_s19  ;;  %s1027_s27 = sshll.u32 %s1543_s14, 1  ;;  %1081 = vmatprep.subr.bf16.mxu0 (!%p1031_p13), %v1275_v5  ;;  %1097 = vmatprep.mubr.msk.bf16.mxu0 (!%p1031_p13), %vm1276_vm0, %v1275_v5  ;;  %v1191_v8 = vld [vmem:[%s1511_s2 + $0x18] sm:$0xff] (!%p1031_p13)   ;;  %v1192_v9 = vld [vmem:[%s1511_s2 + $0x20] sm:$0xff] (!%p1031_p13)   ;;  %v1193_v10 = vld [vmem:[%s1511_s2 + $0x28] sm:$0xff] (!%p1031_p13)   ;;  %vm585_vm1 = vcmask (!%p1031_p13), 257024  }
  0x31   : > { %s452_s11 = scalar_select %p451_p12, %s1257_s13, 1 }
  0x32   : > { %s1419_s19 = scalar_lea.vmem [#allocation4], %s1023_s30  ;;  %469 = sbr.rel (%p1031_p13) target bundleno = 300 (0x12c), region = 94  ;;  %1082 = vmatpush3.bf16.msra.mxu0 (!%p1031_p13), %v1188_v4  ;;  %v1194_v11 = vld [vmem:[%s1511_s2 + $0x30] sm:$0xff] (!%p1031_p13)   ;;  %v1195_v12 = vld [vmem:[%s1511_s2 + $0x38] sm:$0xff] (!%p1031_p13)   ;;  %v1033_v15 = vld [vmem:[%s1512_s3] ss:$0 sm:$0xff] (!%p1031_p13) }
  0x33   : > { %s454_s28 = sadd.s32 %s1027_s27, %s452_s11  ;;  %1083 = vmatprep.subr.bf16.mxu0 (!%p1031_p13), %v1275_v5  ;;  %v1032_v13 = vld [vmem:[%s1402_s23 + $0x10] sm:$0xff] (!%p1031_p13) }
  0x34   : > { %s1028_s29 = sshll.u32 %s454_s28, 3  ;;  %v471_v14 = vpack.c.bf16 (!%p1031_p13), %v1032_v13, %v1032_v13 }
  0x35   : > { %s1412_s0 = scalar_lea.vmem %s1517_s8, %s1028_s29  ;;  %s1417_s21 = scalar_lea.vmem %s1518_s9, %s1028_s29 }
  0x36   : > { %1084 = vmatpush3.bf16.msra.mxu0 (!%p1031_p13), %v1189_v6 }
  0x37   : > { %1085 = vmatprep.subr.bf16.mxu0 (!%p1031_p13), %v1275_v5 }
  0x3a   : > { %1086 = vmatpush3.bf16.msra.mxu0 %v1190_v7 }
  0x3b   : > { %1087 = vmatprep.subr.bf16.mxu0 %v1275_v5 }
  0x3e   : > { %1088 = vmatpush3.bf16.msra.mxu0 %v1191_v8 }
  0x3f   : > { %1089 = vmatprep.subr.bf16.mxu0 %v1275_v5 }
  0x42   : > { %1090 = vmatpush3.bf16.msra.mxu0 %v1192_v9 }
  0x43   : > { %1091 = vmatprep.subr.bf16.mxu0 %v1275_v5 }
  0x46   : > { %1092 = vmatpush3.bf16.msra.mxu0 %v1193_v10 }
  0x47   : > { %1093 = vmatprep.subr.bf16.mxu0 %v1275_v5 }
  0x4a   : > { %1094 = vmatpush3.bf16.msra.mxu0 %v1194_v11 }
  0x4b   : > { %1095 = vmatprep.subr.bf16.mxu0 %v1275_v5 }
  0x4e   : > { %1096 = vmatpush3.bf16.msra.mxu0 %v1195_v12 }
  0x51   : > { %1098 = vmatmul.mubr.bf16.vlgmr.msra.gmra.mrb[0].mxu0 %v471_v14 }
 0x124   : > { %v577_v16 = vpop.f32.mrb[0].mxu0 }
 0x125   : > { %v578_v17 = vadd.f32 %v1033_v15, %v577_v16  ;;  %v1099_v18 = vpop.f32.mrb[1].mxu0 }
 0x126   : > { %v580_v19 = vpop.f32.mrb[2].mxu0 }
 0x127   : > { %v583_v20 = vmax.f32 %v578_v17, 0.0  ;;  %v1100_v21 = vpop.f32.mrb[3].mxu0 }
 0x129   : > { %v584_v22 = vpack.c.bf16 %v583_v20, %v583_v20 }
 0x12b   : > { %586 = vst.msk [vmem:[#allocation2] sm:$0xf] %vm585_vm1, %v584_v22 }
 0x12c PF: > { %v1196_v23 = vld [vmem:[%s1419_s19 + $0x4] ss:$8 sps:$4 sm:$0xff]   ;;  %v1198_v24 = vld [vmem:[%s1419_s19] ss:$8 sps:$4 sm:$0xff]   ;;  %v1277_v25 = vmov 0   ;;  %vm624_vm2 = vcmask 261120   ;;  %v594_v34 = vlaneseq }
 0x12d   : > { %660 = vmatprep.mubr.bf16.mxu0 %v1277_v25  ;;  %628 = vmatprep.subr.bf16.mxu0 %v1196_v23  ;;  %v1199_v26 = vld [vmem:[%s1419_s19 + $0x14] ss:$8 sps:$4 sm:$0xff]   ;;  %v1201_v27 = vld [vmem:[%s1419_s19 + $0x10] ss:$8 sps:$4 sm:$0xff]   ;;  %v1278_v30 = vmov 0.0   ;;  %v1203_v31 = vld [vmem:[%s1515_s6 + $0x8] sm:$0xff]  }
 0x12e   : > { %629 = vmatpush1.bf16.msra.mxu0 %v1198_v24  ;;  %v1202_v29 = vld [vmem:[%s1515_s6] sm:$0xff]   ;;  %1101 = vmatprep.subr.bf16.mxu1 %v1278_v30  ;;  %v1204_v32 = vld [vmem:[%s1515_s6 + $0x10] sm:$0xff]   ;;  %v1205_v33 = vld [vmem:[%s1515_s6 + $0x18] sm:$0xff]   ;;  %v595_v35 = vshrl.u32 %v594_v34, 7  ;;  %s838_s10 = sld [smem:[#allocation3]]  ;;  %vm1279_vm3 = vmmov 0  }
 0x12f   : > { %630 = vmatprep.subr.bf16.mxu0 %v1199_v26  ;;  %1102 = vmatpush3.bf16.msra.mxu1 %v1202_v29  ;;  %v592_v37 = vld [vmem:[%s447_s26] sm:$0x3]  ;;  %v1207_v53 = vld [vmem:[%s1515_s6 + $0x28] sm:$0xff]   ;;  %v1208_v54 = vld [vmem:[%s1515_s6 + $0x30] sm:$0xff]   ;;  %vm791_vm4 = vcmask 130048  }
 0x130   : > { %1103 = vmatprep.subr.bf16.mxu1 %v1278_v30  ;;  %v596_v36 = vsub.s32 0, %v595_v35  ;;  %v600_v38 = vsub.s32 1, %v595_v35  ;;  %v1206_v50 = vld [vmem:[%s1515_s6 + $0x20] sm:$0xff]   ;;  %1117 = vmatprep.mubr.msk.bf16.mxu1 %vm1279_vm3, %v1278_v30  ;;  %v1209_v55 = vld [vmem:[%s1515_s6 + $0x38] sm:$0xff]  }
 0x131   : > { %v1210_v5 = vld [vmem:[%s1516_s7] sm:$0xff]  }
 0x132   : > { %v587_v28 = vld [vmem:[#allocation2] sm:$0xf]  ;;  %631 = vmatpush1.bf16.msra.mxu0 %v1201_v27  ;;  %v597_v39 = vrot.slane %v592_v37, %v596_v36  ;;  %v601_v40 = vrot.slane %v592_v37, %v600_v38 }
 0x133   : > { %1121 = vmatprep.subr.bf16.mxu0 %v1278_v30  ;;  %1104 = vmatpush3.bf16.msra.mxu1 %v1203_v31 }
 0x134   : > { %1105 = vmatprep.subr.bf16.mxu1 %v1278_v30  ;;  %s850_s23 = ssub.f32 1.0, %s838_s10  ;;  %v848_v59 = vstv %s838_s10 }
 0x135   : > { %1046 = vmatmul.mubr.msk.bf16.vlgmr.msra.gmra.mrb[0].mxu0 %vm624_vm2, %v587_v28 }
 0x136   : > { %1123 = vmatprep.mubr.msk.bf16.mxu0 %vm1279_vm3, %v1278_v30  ;;  %s851_s14 = smul.f32 0.0004, %s850_s23  ;;  %1122 = vmatpush3.bf16.msra.mxu0 %v1210_v5 }
 0x137   : > { %1106 = vmatpush3.bf16.msra.mxu1 %v1204_v32 }
 0x138   : > { %1107 = vmatprep.subr.bf16.mxu1 %v1278_v30  ;;  %v852_v61 = vstv %s851_s14 }
 0x13b   : > { %1108 = vmatpush3.bf16.msra.mxu1 %v1205_v33 }
 0x13c   : > { %1109 = vmatprep.subr.bf16.mxu1 %v1278_v30 }
 0x13f   : > { %1110 = vmatpush3.bf16.msra.mxu1 %v1206_v50 }
 0x140   : > { %1111 = vmatprep.subr.bf16.mxu1 %v1278_v30 }
 0x143   : > { %1112 = vmatpush3.bf16.msra.mxu1 %v1207_v53 }
 0x144   : > { %1113 = vmatprep.subr.bf16.mxu1 %v1278_v30 }
 0x147   : > { %1114 = vmatpush3.bf16.msra.mxu1 %v1208_v54 }
 0x148   : > { %1115 = vmatprep.subr.bf16.mxu1 %v1278_v30 }
 0x14b   : > { %1116 = vmatpush3.bf16.msra.mxu1 %v1209_v55 }
 0x208   : > { %v662_v41 = vpop.f32.mrb[0].mxu0 }
 0x209   : > { %v663_v42 = vadd.f32 %v662_v41, %v597_v39  ;;  %v664_v43 = vpop.f32.mrb[1].mxu0 }
 0x20a   : > { %v665_v44 = vadd.f32 %v664_v43, %v601_v40  ;;  %v666_v45 = vpop.f32.mrb[2].mxu0 }
 0x20b   : > { %v667_v46 = vpop.f32.mrb[3].mxu0  ;;  %669 = vmax.xlane.f32.xlu0 %v663_v42 }
 0x20c   : > { %v840_v47 = vand.u32 2147483647, %v665_v44  ;;  %v839_v57 = vmax.f32 %v665_v44, 0.0 }
 0x20e   : > { %v841_v48 = vsub.f32 0.0, %v840_v47 }
 0x210   : > { %v842_v49 = vmul.f32 1.442695, %v841_v48 }
 0x212   : > { %1211 = vpow2.f32 %v842_v49 }
 0x21c   : > { %v1212_v51 = vpop.eup %1211 }
 0x21d   : > { %v844_v52 = vadd.f32 1.0, %v1212_v51 }
 0x21f   : > { %1213 = vlog2.f32 %v844_v52 }
 0x229   : > { %v1214_v56 = vpop.eup %1213 }
 0x22a   : > { %v846_v58 = vmul.f32 0.6931472, %v1214_v56 }
 0x22c   : > { %v847_v60 = vadd.f32 %v846_v58, %v839_v57 }
 0x22e   : > { %v849_v62 = vmul.f32 %v848_v59, %v847_v60 }
 0x230   : > { %v853_v63 = vadd.f32 %v852_v61, %v849_v62 }
 0x232   : > { %854 = vst [vmem:[%s1417_s21] sm:$0xff] %v853_v63 }
 0x298   : > { %v670_v0 = vpop.xlane.xlu0 %669 }
 0x299   : > { %v671_v1 = vsub.f32 %v663_v42, %v670_v0 }
 0x29b   : > { %v672_v2 = vmul.f32 1.442695, %v671_v1 }
 0x29d   : > { %1215 = vpow2.f32 %v672_v2 }
 0x2a7   : > { %v1216_v3 = vpop.eup %1215 }
 0x2a8   : > { %v674_v4 = vpack.c.bf16 %v1216_v3, %v1216_v3 }
 0x2aa   : > { %1118 = vmatmul.mubr.bf16.vlgmr.msra.gmra.mrb[0].mxu1 %v674_v4  ;;  %v835_v13 = vunpack.c.l.bf16 %v674_v4 }
 0x37d   : > { %v773_v6 = vpop.f32.mrb[0].mxu1 }
 0x37e   : > { %v779_v7 = vmax.f32 %v773_v6, 1e-30  ;;  %v1119_v8 = vpop.f32.mrb[1].mxu1 }
 0x37f   : > { %v776_v9 = vpop.f32.mrb[2].mxu1 }
 0x380   : > { %1217 = vrcp.f32 %v779_v7  ;;  %v1120_v10 = vpop.f32.mrb[3].mxu1 }
 0x38a   : > { %v1218_v11 = vpop.eup %1217 }
 0x38b   : > { %v782_v12 = vpack.c.bf16 %v1218_v11, %v1218_v11 }
 0x38d   : > { %1124 = vmatmul.mubr.msk.bf16.vlgmr.msra.gmra.mrb[4].mxu0 %vm791_vm4, %v782_v12 }
 0x460   : > { %v829_v14 = vpop.f32.mrb[4].mxu0 }
 0x461   : > { %v836_v15 = vmul.f32 %v835_v13, %v829_v14  ;;  %v1125_v16 = vpop.f32.mrb[5].mxu0 }
 0x462   : > { %v832_v17 = vpop.f32.mrb[6].mxu0 }
 0x463   : > { %837 = vst [vmem:[%s1412_s0] sm:$0xff] %v836_v15  ;;  %v1126_v18 = vpop.f32.mrb[7].mxu0 }
 0x464 PF: > { %s21_s17 = sadd.s32 1, %s1273_s17   ;;  %s1529_s21 = sld [smem:[#allocation9_spill]] }
 0x465   : > { %p18_p0 = scmp.ge.s32.totalorder %s21_s17, 6   ;;  %s1530_s13 = sld [smem:[#allocation5_spill]] }
 0x466   : > { %s1531_s14 = sld [smem:[#allocation6_spill]]  ;;  %s1532_s15 = sld [smem:[#allocation7_spill]] }
 0x467   : > { %s1533_s16 = sld [smem:[#allocation8_spill]]  ;;  %s1534_s11 = smov %s1253_s12 }
 0x468   :  { %20 = sbr.rel (!%p18_p0) target bundleno = 7 (0x7), region = 147 }
 0x46a   : > { %s1535_s12 = smov %s1529_s21 }

</bundles_post_ra>
